<compile_context>
chip_gen: v6e
topology: v6e:2x2x1
jax: 0.10.0
libtpu: 0.0.40
codegen_flags: <defaults>
</compile_context>

<pallas_src>
import functools

import jax
import jax.numpy as jnp
from jax import lax
from jax.experimental import pallas as pl
from jax.experimental.pallas import tpu as pltpu

_MLP_DTYPE = jnp.bfloat16  # MXU operand dtype for the 1x1-conv matmuls.


# ----------------------------------------------------------------------------
# Fused kernel factory: 3-NN interpolation + concat-as-split-matmul + MLP stack
# ----------------------------------------------------------------------------
def _make_fused_kernel(num_layers, has_points1, fuse_interp, s_total):
    """Builds the kernel body for a given layer count / input configuration."""

    def kernel(*refs):
        it = iter(refs)
        if fuse_interp:
            xyz1_ref = next(it)     # (1, C, TN)   original NCW layout
            x1sq_ref = next(it)     # (1, 1, TN)
            xyz2n_ref = next(it)    # (1, S, C)    rows pre-scaled by -2
            x2sq_ref = next(it)     # (1, S, 1)
            pts2_ref = next(it)     # (1, D2, S)   original NCW layout
            p1_ref = next(it) if has_points1 else None
        else:
            x_ref = next(it)        # (1, Cin0, TN)  pre-concatenated (S == 1)
            p1_ref = None
        layers = []
        for li in range(num_layers):
            if li == 0 and fuse_interp and has_points1:
                layers.append((next(it), next(it), next(it)))  # (W_p1, W_interp, b)
            else:
                layers.append((next(it), next(it)))            # (W, b)
        out_ref = next(it)          # (1, Cout, TN)

        if fuse_interp:
            x1 = xyz1_ref[0].astype(jnp.float32)      # [C, TN]
            x2n = xyz2n_ref[0].astype(jnp.float32)    # [S, C]  (already * -2)
            x1sq = x1sq_ref[0]                        # [1, TN]
            x2sq = x2sq_ref[0]                        # [S, 1]
            p2t = pts2_ref[0].astype(jnp.float32)     # [D2, S]

            # d[s, n] = ||x2_s||^2 + ||x1_n||^2 - 2 * x2_s . x1_n   (clamped >= 0)
            cross = jnp.dot(x2n, x1, preferred_element_type=jnp.float32)  # [S, TN]
            d = jnp.maximum(cross + x1sq + x2sq, 0.0)

            s_dim, tn = d.shape
            row = lax.broadcasted_iota(jnp.int32, (s_dim, tn), 0)

            # Peel off the 3 nearest neighbors (== sort(...)[:3]) with
            # smallest-index tie-break; one-hot selectors turn the gather into
            # a single MXU matmul.
            recips, onehots = [], []
            dd = d
            for _ in range(3):
                minval = jnp.min(dd, axis=0, keepdims=True)                 # [1, TN]
                idx = jnp.min(jnp.where(dd == minval, row, s_dim),
                              axis=0, keepdims=True)                        # [1, TN]
                onehot = row == idx                                         # [S, TN]
                r = pl.reciprocal(minval + 1e-8, approx=True)
                if s_total < 3:
                    r = jnp.where(jnp.isfinite(minval), r, 0.0)
                recips.append(r)
                onehots.append(onehot)
                dd = jnp.where(onehot, jnp.inf, dd)

            inv_norm = pl.reciprocal(recips[0] + recips[1] + recips[2],
                                     approx=True)
            w = ((recips[0] * inv_norm) * onehots[0].astype(jnp.float32)
                 + (recips[1] * inv_norm) * onehots[1].astype(jnp.float32)
                 + (recips[2] * inv_norm) * onehots[2].astype(jnp.float32))  # [S,TN]
            act = jnp.dot(p2t, w, preferred_element_type=jnp.float32)        # [D2,TN]
        else:
            act = x_ref[0].astype(jnp.float32)

        # --- MLP stack: 1x1 conv + folded BN affine + ReLU, VMEM-resident ---
        if fuse_interp and has_points1:
            w_p1, w_in, b0 = layers[0]
            y = jnp.dot(w_in[...], act.astype(_MLP_DTYPE),
                        preferred_element_type=jnp.float32)
            y = y + jnp.dot(w_p1[...], p1_ref[0].astype(_MLP_DTYPE),
                            preferred_element_type=jnp.float32)
        else:
            w_in, b0 = layers[0]
            y = jnp.dot(w_in[...], act.astype(_MLP_DTYPE),
                        preferred_element_type=jnp.float32)
        y = jnp.maximum(y + b0[...], 0.0)
        for w_r, b_r in layers[1:]:
            y = jnp.dot(w_r[...], y.astype(_MLP_DTYPE),
                        preferred_element_type=jnp.float32)
            y = jnp.maximum(y + b_r[...], 0.0)
        out_ref[0] = y.astype(out_ref.dtype)

    return kernel


# ----------------------------------------------------------------------------
# Module: parameter init + forward
# ----------------------------------------------------------------------------
def init_params(key, in_channel, mlp):
    """Deterministic synthetic params matching Conv1d(1x1)+BatchNorm1d layers."""
    params = []
    last = in_channel
    for out in mlp:
        key, k1, k2, k3, k4, k5, k6 = jax.random.split(key, 7)
        params.append(dict(
            w=jax.random.normal(k1, (out, last), jnp.float32) * 0.1,  # Conv1d weight
            b=jax.random.normal(k2, (out,), jnp.float32) * 0.1,       # Conv1d bias
            gamma=1.0 + 0.1 * jax.random.normal(k3, (out,), jnp.float32),
            beta=0.1 * jax.random.normal(k4, (out,), jnp.float32),
            mean=0.1 * jax.random.normal(k5, (out,), jnp.float32),
            var=jnp.abs(jax.random.normal(k6, (out,), jnp.float32)) * 0.1 + 0.9,
        ))
        last = out
    return params


def pointnet_fp_forward(params, xyz1, xyz2, points1, points2):
    """
    xyz1:    [B, C, N]   xyz2:    [B, C, S]
    points1: [B, D1, N] or None   points2: [B, D2, S]
    returns: [B, mlp[-1], N]
    """
    B, C, N = xyz1.shape
    _, D2, S = points2.shape
    has_p1 = points1 is not None
    D1 = points1.shape[1] if has_p1 else 0
    fuse_interp = S > 1
    num_layers = len(params)

    # Fold conv bias + eval-mode BatchNorm into per-layer (W_eff, b_eff),
    # keeping the conv's native [Cout, Cin] orientation (channels-first).
    eps = 1e-5  # PyTorch BatchNorm1d default
    layer_wb = []
    for p in params:
        scale = p["gamma"] / jnp.sqrt(p["var"] + eps)            # [Cout]
        w_eff = p["w"] * scale[:, None]                          # [Cout, Cin]
        b_eff = (p["b"] - p["mean"]) * scale + p["beta"]         # [Cout]
        layer_wb.append((w_eff, b_eff))
    cout_last = layer_wb[-1][0].shape[0]

    # Tile the query axis.  TN is a multiple of 128 (or == N); capped so the
    # [S,TN] f32 distance temporaries fit the default scoped VMEM on all of
    # v5e / v6e / v7x.
    tn = min(N, 256 if S >= 1024 else 512)
    n_tiles = pl.cdiv(N, tn)

    inputs = []
    in_specs = []

    if fuse_interp:
        xyz2_sc = jnp.transpose(xyz2, (0, 2, 1)).astype(jnp.float32)   # [B, S, C] (tiny)
        neg2_xyz2 = -2.0 * xyz2_sc                                      # fold the *2
        x1sq = jnp.sum(xyz1.astype(jnp.float32) ** 2,
                       axis=1, keepdims=True)                           # [B, 1, N]
        x2sq = jnp.sum(xyz2_sc ** 2, axis=-1, keepdims=True)            # [B, S, 1]
        inputs += [xyz1, x1sq, neg2_xyz2, x2sq, points2]
        in_specs += [
            pl.BlockSpec((1, C, tn), lambda b, n: (b, 0, n)),
            pl.BlockSpec((1, 1, tn), lambda b, n: (b, 0, n)),
            pl.BlockSpec((1, S, C), lambda b, n: (b, 0, 0)),
            pl.BlockSpec((1, S, 1), lambda b, n: (b, 0, 0)),
            pl.BlockSpec((1, D2, S), lambda b, n: (b, 0, 0)),
        ]
        if has_p1:
            inputs.append(points1)
            in_specs.append(pl.BlockSpec((1, D1, tn), lambda b, n: (b, 0, n)))
    else:
        # S == 1: PyTorch branch points2.repeat(1, N, 1); trivial broadcast +
        # concat as JAX glue, then run the fused MLP stack only.
        interp_t = jnp.broadcast_to(points2.astype(jnp.float32), (B, D2, N))
        x_pre = (jnp.concatenate([points1.astype(jnp.float32), interp_t], axis=1)
                 if has_p1 else interp_t)
        cin0 = x_pre.shape[1]
        inputs.append(x_pre)
        in_specs.append(pl.BlockSpec((1, cin0, tn), lambda b, n: (b, 0, n)))

    for li, (w_eff, b_eff) in enumerate(layer_wb):
        cout, cin = w_eff.shape
        w_c = w_eff.astype(_MLP_DTYPE)
        b_c = b_eff.astype(jnp.float32).reshape(cout, 1)
        if li == 0 and fuse_interp and has_p1:
            # Split columns so concat([points1, interp]) becomes two matmuls.
            inputs += [w_c[:, :D1], w_c[:, D1:], b_c]
            in_specs += [
                pl.BlockSpec((cout, D1), lambda b, n: (0, 0)),
                pl.BlockSpec((cout, cin - D1), lambda b, n: (0, 0)),
                pl.BlockSpec((cout, 1), lambda b, n: (0, 0)),
            ]
        else:
            inputs += [w_c, b_c]
            in_specs += [
                pl.BlockSpec((cout, cin), lambda b, n: (0, 0)),
                pl.BlockSpec((cout, 1), lambda b, n: (0, 0)),
            ]

    kernel = _make_fused_kernel(num_layers, has_p1, fuse_interp, S)
    out = pl.pallas_call(
        kernel,
        out_shape=jax.ShapeDtypeStruct((B, cout_last, N), jnp.float32),
        grid=(B, n_tiles),
        in_specs=in_specs,
        out_specs=pl.BlockSpec((1, cout_last, tn), lambda b, n: (b, 0, n)),
        compiler_params=pltpu.CompilerParams(
            dimension_semantics=("parallel", "parallel")),
    )(*inputs)
    return out                                        # already [B, Cout, N]


# ----------------------------------------------------------------------------
# Pure-JAX reference (for correctness check)
# ----------------------------------------------------------------------------
def reference_forward(params, xyz1, xyz2, points1, points2):
    xyz1_t = jnp.transpose(xyz1, (0, 2, 1))
    xyz2_t = jnp.transpose(xyz2, (0, 2, 1))
    pts2_t = jnp.transpose(points2, (0, 2, 1))
    B, N, _ = xyz1_t.shape
    _, S, D2 = pts2_t.shape
    if S == 1:
        interp = jnp.broadcast_to(pts2_t, (B, N, D2))
    else:
        d = (-2.0 * jnp.einsum('bnc,bmc->bnm', xyz1_t, xyz2_t)
             + jnp.sum(xyz1_t ** 2, -1)[:, :, None]
             + jnp.sum(xyz2_t ** 2, -1)[:, None, :])
        idx = jnp.argsort(d, axis=-1)[:, :, :3]                       # [B, N, 3]
        dists = jnp.take_along_axis(d, idx, axis=-1)
        recip = 1.0 / (dists + 1e-8)
        weight = recip / jnp.sum(recip, axis=-1, keepdims=True)
        gathered = jax.vmap(lambda p, i: p[i])(pts2_t, idx)           # [B, N, 3, D2]
        interp = jnp.sum(gathered * weight[..., None], axis=2)

    if points1 is not None:
        x = jnp.concatenate([jnp.transpose(points1, (0, 2, 1)), interp], -1)
    else:
        x = interp

    eps = 1e-5
    for p in params:
        y = jnp.einsum('bnc,oc->bno', x, p["w"]) + p["b"]
        y = (y - p["mean"]) / jnp.sqrt(p["var"] + eps) * p["gamma"] + p["beta"]
        x = jnp.maximum(y, 0.0)
    return jnp.transpose(x, (0, 2, 1))


if __name__ == "__main__":
    key = jax.random.PRNGKey(0)
    B, C, N, S = 2, 3, 16, 8
    D1, D2 = 4, 6
    mlp = [32, 16]

    k1, k2, k3, k4, kp, kp2 = jax.random.split(key, 6)
    xyz1 = jax.random.normal(k1, (B, C, N), jnp.float32)
    xyz2 = jax.random.normal(k2, (B, C, S), jnp.float32)
    points1 = jax.random.normal(k3, (B, D1, N), jnp.float32)
    points2 = jax.random.normal(k4, (B, D2, S), jnp.float32)

    # Path 1: with points1 (concat fused into the first layer).
    params = init_params(kp, D1 + D2, mlp)
    fwd = jax.jit(functools.partial(pointnet_fp_forward, params))
    out = jax.block_until_ready(fwd(xyz1, xyz2, points1, points2))
    ref = reference_forward(params, xyz1, xyz2, points1, points2)
    assert out.shape == (B, mlp[-1], N), out.shape
    err = float(jnp.max(jnp.abs(out - ref)))
    assert jnp.allclose(out, ref, atol=2e-2, rtol=2e-2), err

    # Path 2: points1 is None.
    params2 = init_params(kp2, D2, mlp)
    fwd2 = jax.jit(functools.partial(pointnet_fp_forward, params2))
    out2 = jax.block_until_ready(fwd2(xyz1, xyz2, None, points2))
    ref2 = reference_forward(params2, xyz1, xyz2, None, points2)
    assert out2.shape == (B, mlp[-1], N), out2.shape
    err2 = float(jnp.max(jnp.abs(out2 - ref2)))
    assert jnp.allclose(out2, ref2, atol=2e-2, rtol=2e-2), err2

    print("KERNEL_OK")
</pallas_src>

<mosaic_0001>
module attributes {stable_mosaic.version = 11 : i64} {
  func.func @kernel(%arg0: i32, %arg1: i32, %arg2: memref<1x3x16xf32, #tpu.memory_space<vmem>>, %arg3: memref<1x1x16xf32, #tpu.memory_space<vmem>>, %arg4: memref<1x8x3xf32, #tpu.memory_space<vmem>>, %arg5: memref<1x8x1xf32, #tpu.memory_space<vmem>>, %arg6: memref<1x6x8xf32, #tpu.memory_space<vmem>>, %arg7: memref<1x4x16xf32, #tpu.memory_space<vmem>>, %arg8: memref<32x4xbf16, #tpu.memory_space<vmem>>, %arg9: memref<32x6xbf16, #tpu.memory_space<vmem>>, %arg10: memref<32x1xf32, #tpu.memory_space<vmem>>, %arg11: memref<16x32xbf16, #tpu.memory_space<vmem>>, %arg12: memref<16x1xf32, #tpu.memory_space<vmem>>, %arg13: memref<1x16x16xf32, #tpu.memory_space<vmem>>) attributes {dimension_semantics = [#tpu.dimension_semantics<parallel>, #tpu.dimension_semantics<parallel>], iteration_bounds = array<i64: 2, 1>, scalar_prefetch = 0 : i64, scratch_operands = 0 : i64, tpu.core_type = #tpu.core_type<tc>, window_params = [{transform_indices = @transform_0, window_bounds = array<i64: 1, 3, 16>}, {transform_indices = @transform_1, window_bounds = array<i64: 1, 1, 16>}, {transform_indices = @transform_2, window_bounds = array<i64: 1, 8, 3>}, {transform_indices = @transform_3, window_bounds = array<i64: 1, 8, 1>}, {transform_indices = @transform_4, window_bounds = array<i64: 1, 6, 8>}, {transform_indices = @transform_5, window_bounds = array<i64: 1, 4, 16>}, {pipeline_mode = #tpu.pipeline_mode<synchronous>, transform_indices = @transform_6, window_bounds = array<i64: 32, 4>}, {pipeline_mode = #tpu.pipeline_mode<synchronous>, transform_indices = @transform_7, window_bounds = array<i64: 32, 6>}, {pipeline_mode = #tpu.pipeline_mode<synchronous>, transform_indices = @transform_8, window_bounds = array<i64: 32, 1>}, {pipeline_mode = #tpu.pipeline_mode<synchronous>, transform_indices = @transform_9, window_bounds = array<i64: 16, 32>}, {pipeline_mode = #tpu.pipeline_mode<synchronous>, transform_indices = @transform_10, window_bounds = array<i64: 16, 1>}, {transform_indices = @transform_11, window_bounds = array<i64: 1, 16, 16>}]} {
    %c0 = arith.constant 0 : index
    %c0_0 = arith.constant 0 : index
    %c0_1 = arith.constant 0 : index
    %0 = vector.load %arg2[%c0, %c0_0, %c0_1] : memref<1x3x16xf32, #tpu.memory_space<vmem>>, vector<1x3x16xf32>
    %1 = vector.shape_cast %0 : vector<1x3x16xf32> to vector<3x16xf32>
    %c0_2 = arith.constant 0 : index
    %c0_3 = arith.constant 0 : index
    %c0_4 = arith.constant 0 : index
    %2 = vector.load %arg4[%c0_2, %c0_3, %c0_4] : memref<1x8x3xf32, #tpu.memory_space<vmem>>, vector<1x8x3xf32>
    %3 = vector.shape_cast %2 : vector<1x8x3xf32> to vector<8x3xf32>
    %c0_5 = arith.constant 0 : index
    %c0_6 = arith.constant 0 : index
    %c0_7 = arith.constant 0 : index
    %4 = vector.load %arg3[%c0_5, %c0_6, %c0_7] : memref<1x1x16xf32, #tpu.memory_space<vmem>>, vector<1x1x16xf32>
    %5 = vector.shape_cast %4 : vector<1x1x16xf32> to vector<1x16xf32>
    %c0_8 = arith.constant 0 : index
    %c0_9 = arith.constant 0 : index
    %c0_10 = arith.constant 0 : index
    %6 = vector.load %arg5[%c0_8, %c0_9, %c0_10] : memref<1x8x1xf32, #tpu.memory_space<vmem>>, vector<1x8x1xf32>
    %7 = vector.shape_cast %6 : vector<1x8x1xf32> to vector<8x1xf32>
    %c0_11 = arith.constant 0 : index
    %c0_12 = arith.constant 0 : index
    %c0_13 = arith.constant 0 : index
    %8 = vector.load %arg6[%c0_11, %c0_12, %c0_13] : memref<1x6x8xf32, #tpu.memory_space<vmem>>, vector<1x6x8xf32>
    %9 = vector.shape_cast %8 : vector<1x6x8xf32> to vector<6x8xf32>
    %cst = arith.constant dense<0.000000e+00> : vector<8x16xf32>
    %10 = tpu.matmul %3, %1, %cst {dimension_numbers = #tpu.dot_dimension_numbers<[1], [0], [0], [1], [0, 0, 1, 1], [], []>} : vector<8x3xf32>, vector<3x16xf32>, vector<8x16xf32> -> vector<8x16xf32>
    %11 = vector.broadcast %5 : vector<1x16xf32> to vector<8x16xf32>
    %12 = arith.addf %10, %11 : vector<8x16xf32>
    %13 = vector.broadcast %7 : vector<8x1xf32> to vector<8x16xf32>
    %14 = arith.addf %12, %13 : vector<8x16xf32>
    %cst_14 = arith.constant 0.000000e+00 : f32
    %15 = vector.broadcast %cst_14 : f32 to vector<8x16xf32>
    %16 = arith.maximumf %14, %15 : vector<8x16xf32>
    %17 = tpu.iota {dimensions = array<i32: 0>} : vector<8x16xi32>
    %cst_15 = arith.constant dense<0x7F800000> : vector<16xf32>
    %18 = vector.multi_reduction <minimumf>, %16, %cst_15 [0] : vector<8x16xf32> to vector<16xf32>
    %19 = vector.shape_cast %18 : vector<16xf32> to vector<1x16xf32>
    %20 = vector.broadcast %19 : vector<1x16xf32> to vector<8x16xf32>
    %21 = arith.cmpf oeq, %16, %20 : vector<8x16xf32>
    %c8_i32 = arith.constant 8 : i32
    %22 = vector.broadcast %c8_i32 : i32 to vector<8x16xi32>
    %23 = arith.select %21, %17, %22 : vector<8x16xi1>, vector<8x16xi32>
    %cst_16 = arith.constant dense<2147483647> : vector<16xi32>
    %24 = vector.multi_reduction <minsi>, %23, %cst_16 [0] : vector<8x16xi32> to vector<16xi32>
    %25 = vector.shape_cast %24 : vector<16xi32> to vector<1x16xi32>
    %26 = vector.broadcast %25 : vector<1x16xi32> to vector<8x16xi32>
    %27 = arith.cmpi eq, %17, %26 : vector<8x16xi32>
    %cst_17 = arith.constant 9.99999993E-9 : f32
    %28 = vector.broadcast %cst_17 : f32 to vector<1x16xf32>
    %29 = arith.addf %19, %28 : vector<1x16xf32>
    %30 = tpu.reciprocal %29 {approx = true} : vector<1x16xf32> -> vector<1x16xf32>
    %cst_18 = arith.constant 0x7F800000 : f32
    %31 = vector.broadcast %cst_18 : f32 to vector<8x16xf32>
    %32 = arith.select %27, %31, %16 : vector<8x16xi1>, vector<8x16xf32>
    %cst_19 = arith.constant dense<0x7F800000> : vector<16xf32>
    %33 = vector.multi_reduction <minimumf>, %32, %cst_19 [0] : vector<8x16xf32> to vector<16xf32>
    %34 = vector.shape_cast %33 : vector<16xf32> to vector<1x16xf32>
    %35 = vector.broadcast %34 : vector<1x16xf32> to vector<8x16xf32>
    %36 = arith.cmpf oeq, %32, %35 : vector<8x16xf32>
    %c8_i32_20 = arith.constant 8 : i32
    %37 = vector.broadcast %c8_i32_20 : i32 to vector<8x16xi32>
    %38 = arith.select %36, %17, %37 : vector<8x16xi1>, vector<8x16xi32>
    %cst_21 = arith.constant dense<2147483647> : vector<16xi32>
    %39 = vector.multi_reduction <minsi>, %38, %cst_21 [0] : vector<8x16xi32> to vector<16xi32>
    %40 = vector.shape_cast %39 : vector<16xi32> to vector<1x16xi32>
    %41 = vector.broadcast %40 : vector<1x16xi32> to vector<8x16xi32>
    %42 = arith.cmpi eq, %17, %41 : vector<8x16xi32>
    %cst_22 = arith.constant 9.99999993E-9 : f32
    %43 = vector.broadcast %cst_22 : f32 to vector<1x16xf32>
    %44 = arith.addf %34, %43 : vector<1x16xf32>
    %45 = tpu.reciprocal %44 {approx = true} : vector<1x16xf32> -> vector<1x16xf32>
    %cst_23 = arith.constant 0x7F800000 : f32
    %46 = vector.broadcast %cst_23 : f32 to vector<8x16xf32>
    %47 = arith.select %42, %46, %32 : vector<8x16xi1>, vector<8x16xf32>
    %cst_24 = arith.constant dense<0x7F800000> : vector<16xf32>
    %48 = vector.multi_reduction <minimumf>, %47, %cst_24 [0] : vector<8x16xf32> to vector<16xf32>
    %49 = vector.shape_cast %48 : vector<16xf32> to vector<1x16xf32>
    %50 = vector.broadcast %49 : vector<1x16xf32> to vector<8x16xf32>
    %51 = arith.cmpf oeq, %47, %50 : vector<8x16xf32>
    %c8_i32_25 = arith.constant 8 : i32
    %52 = vector.broadcast %c8_i32_25 : i32 to vector<8x16xi32>
    %53 = arith.select %51, %17, %52 : vector<8x16xi1>, vector<8x16xi32>
    %cst_26 = arith.constant dense<2147483647> : vector<16xi32>
    %54 = vector.multi_reduction <minsi>, %53, %cst_26 [0] : vector<8x16xi32> to vector<16xi32>
    %55 = vector.shape_cast %54 : vector<16xi32> to vector<1x16xi32>
    %56 = vector.broadcast %55 : vector<1x16xi32> to vector<8x16xi32>
    %57 = arith.cmpi eq, %17, %56 : vector<8x16xi32>
    %cst_27 = arith.constant 9.99999993E-9 : f32
    %58 = vector.broadcast %cst_27 : f32 to vector<1x16xf32>
    %59 = arith.addf %49, %58 : vector<1x16xf32>
    %60 = tpu.reciprocal %59 {approx = true} : vector<1x16xf32> -> vector<1x16xf32>
    %61 = arith.addf %30, %45 : vector<1x16xf32>
    %62 = arith.addf %61, %60 : vector<1x16xf32>
    %63 = tpu.reciprocal %62 {approx = true} : vector<1x16xf32> -> vector<1x16xf32>
    %64 = arith.mulf %30, %63 : vector<1x16xf32>
    %65 = arith.extui %27 : vector<8x16xi1> to vector<8x16xi32>
    %66 = arith.sitofp %65 : vector<8x16xi32> to vector<8x16xf32>
    %67 = vector.broadcast %64 : vector<1x16xf32> to vector<8x16xf32>
    %68 = arith.mulf %67, %66 : vector<8x16xf32>
    %69 = arith.mulf %45, %63 : vector<1x16xf32>
    %70 = arith.extui %42 : vector<8x16xi1> to vector<8x16xi32>
    %71 = arith.sitofp %70 : vector<8x16xi32> to vector<8x16xf32>
    %72 = vector.broadcast %69 : vector<1x16xf32> to vector<8x16xf32>
    %73 = arith.mulf %72, %71 : vector<8x16xf32>
    %74 = arith.addf %68, %73 : vector<8x16xf32>
    %75 = arith.mulf %60, %63 : vector<1x16xf32>
    %76 = arith.extui %57 : vector<8x16xi1> to vector<8x16xi32>
    %77 = arith.sitofp %76 : vector<8x16xi32> to vector<8x16xf32>
    %78 = vector.broadcast %75 : vector<1x16xf32> to vector<8x16xf32>
    %79 = arith.mulf %78, %77 : vector<8x16xf32>
    %80 = arith.addf %74, %79 : vector<8x16xf32>
    %cst_28 = arith.constant dense<0.000000e+00> : vector<6x16xf32>
    %81 = tpu.matmul %9, %80, %cst_28 {dimension_numbers = #tpu.dot_dimension_numbers<[1], [0], [0], [1], [0, 0, 1, 1], [], []>} : vector<6x8xf32>, vector<8x16xf32>, vector<6x16xf32> -> vector<6x16xf32>
    %c0_29 = arith.constant 0 : index
    %c0_30 = arith.constant 0 : index
    %82 = vector.load %arg9[%c0_29, %c0_30] : memref<32x6xbf16, #tpu.memory_space<vmem>>, vector<32x6xbf16>
    %83 = arith.truncf %81 : vector<6x16xf32> to vector<6x16xbf16>
    %cst_31 = arith.constant dense<0.000000e+00> : vector<32x16xf32>
    %84 = tpu.matmul %82, %83, %cst_31 {dimension_numbers = #tpu.dot_dimension_numbers<[1], [0], [0], [1], [0, 0, 1, 1], [], []>} : vector<32x6xbf16>, vector<6x16xbf16>, vector<32x16xf32> -> vector<32x16xf32>
    %c0_32 = arith.constant 0 : index
    %c0_33 = arith.constant 0 : index
    %85 = vector.load %arg8[%c0_32, %c0_33] : memref<32x4xbf16, #tpu.memory_space<vmem>>, vector<32x4xbf16>
    %c0_34 = arith.constant 0 : index
    %c0_35 = arith.constant 0 : index
    %c0_36 = arith.constant 0 : index
    %86 = vector.load %arg7[%c0_34, %c0_35, %c0_36] : memref<1x4x16xf32, #tpu.memory_space<vmem>>, vector<1x4x16xf32>
    %87 = vector.shape_cast %86 : vector<1x4x16xf32> to vector<4x16xf32>
    %88 = arith.truncf %87 : vector<4x16xf32> to vector<4x16xbf16>
    %cst_37 = arith.constant dense<0.000000e+00> : vector<32x16xf32>
    %89 = tpu.matmul %85, %88, %cst_37 {dimension_numbers = #tpu.dot_dimension_numbers<[1], [0], [0], [1], [0, 0, 1, 1], [], []>} : vector<32x4xbf16>, vector<4x16xbf16>, vector<32x16xf32> -> vector<32x16xf32>
    %90 = arith.addf %84, %89 : vector<32x16xf32>
    %c0_38 = arith.constant 0 : index
    %c0_39 = arith.constant 0 : index
    %91 = vector.load %arg10[%c0_38, %c0_39] : memref<32x1xf32, #tpu.memory_space<vmem>>, vector<32x1xf32>
    %92 = vector.broadcast %91 : vector<32x1xf32> to vector<32x16xf32>
    %93 = arith.addf %90, %92 : vector<32x16xf32>
    %cst_40 = arith.constant 0.000000e+00 : f32
    %94 = vector.broadcast %cst_40 : f32 to vector<32x16xf32>
    %95 = arith.maximumf %93, %94 : vector<32x16xf32>
    %c0_41 = arith.constant 0 : index
    %c0_42 = arith.constant 0 : index
    %96 = vector.load %arg11[%c0_41, %c0_42] : memref<16x32xbf16, #tpu.memory_space<vmem>>, vector<16x32xbf16>
    %97 = arith.truncf %95 : vector<32x16xf32> to vector<32x16xbf16>
    %cst_43 = arith.constant dense<0.000000e+00> : vector<16x16xf32>
    %98 = tpu.matmul %96, %97, %cst_43 {dimension_numbers = #tpu.dot_dimension_numbers<[1], [0], [0], [1], [0, 0, 1, 1], [], []>} : vector<16x32xbf16>, vector<32x16xbf16>, vector<16x16xf32> -> vector<16x16xf32>
    %c0_44 = arith.constant 0 : index
    %c0_45 = arith.constant 0 : index
    %99 = vector.load %arg12[%c0_44, %c0_45] : memref<16x1xf32, #tpu.memory_space<vmem>>, vector<16x1xf32>
    %100 = vector.broadcast %99 : vector<16x1xf32> to vector<16x16xf32>
    %101 = arith.addf %98, %100 : vector<16x16xf32>
    %cst_46 = arith.constant 0.000000e+00 : f32
    %102 = vector.broadcast %cst_46 : f32 to vector<16x16xf32>
    %103 = arith.maximumf %101, %102 : vector<16x16xf32>
    %c0_47 = arith.constant 0 : index
    %c0_48 = arith.constant 0 : index
    %c0_49 = arith.constant 0 : index
    %104 = vector.load %arg13[%c0_47, %c0_48, %c0_49] : memref<1x16x16xf32, #tpu.memory_space<vmem>>, vector<1x16x16xf32>
    %105 = vector.shape_cast %104 : vector<1x16x16xf32> to vector<16x16xf32>
    %106 = vector.shape_cast %103 : vector<16x16xf32> to vector<1x16x16xf32>
    tpu.vector_store %arg13[%c0_47, %c0_48, %c0_49], %106 {strides = array<i32>} : memref<1x16x16xf32, #tpu.memory_space<vmem>>, vector<1x16x16xf32>,
    return
  }
  func.func @transform_0(%arg0: i32, %arg1: i32) -> (i32, i32, i32) {
    %c0_i32 = arith.constant 0 : i32
    %c0_i32_0 = arith.constant 0 : i32
    return %arg0, %c0_i32, %arg1 : i32, i32, i32
  }
  func.func @transform_1(%arg0: i32, %arg1: i32) -> (i32, i32, i32) {
    %c0_i32 = arith.constant 0 : i32
    %c0_i32_0 = arith.constant 0 : i32
    return %arg0, %c0_i32, %arg1 : i32, i32, i32
  }
  func.func @transform_2(%arg0: i32, %arg1: i32) -> (i32, i32, i32) {
    %c0_i32 = arith.constant 0 : i32
    %c0_i32_0 = arith.constant 0 : i32
    %c0_i32_1 = arith.constant 0 : i32
    return %arg0, %c0_i32, %c0_i32_0 : i32, i32, i32
  }
  func.func @transform_3(%arg0: i32, %arg1: i32) -> (i32, i32, i32) {
    %c0_i32 = arith.constant 0 : i32
    %c0_i32_0 = arith.constant 0 : i32
    %c0_i32_1 = arith.constant 0 : i32
    return %arg0, %c0_i32, %c0_i32_0 : i32, i32, i32
  }
  func.func @transform_4(%arg0: i32, %arg1: i32) -> (i32, i32, i32) {
    %c0_i32 = arith.constant 0 : i32
    %c0_i32_0 = arith.constant 0 : i32
    %c0_i32_1 = arith.constant 0 : i32
    return %arg0, %c0_i32, %c0_i32_0 : i32, i32, i32
  }
  func.func @transform_5(%arg0: i32, %arg1: i32) -> (i32, i32, i32) {
    %c0_i32 = arith.constant 0 : i32
    %c0_i32_0 = arith.constant 0 : i32
    return %arg0, %c0_i32, %arg1 : i32, i32, i32
  }
  func.func @transform_6(%arg0: i32, %arg1: i32) -> (i32, i32) {
    %c0_i32 = arith.constant 0 : i32
    %c0_i32_0 = arith.constant 0 : i32
    %c0_i32_1 = arith.constant 0 : i32
    return %c0_i32, %c0_i32_0 : i32, i32
  }
  func.func @transform_7(%arg0: i32, %arg1: i32) -> (i32, i32) {
    %c0_i32 = arith.constant 0 : i32
    %c0_i32_0 = arith.constant 0 : i32
    %c0_i32_1 = arith.constant 0 : i32
    return %c0_i32, %c0_i32_0 : i32, i32
  }
  func.func @transform_8(%arg0: i32, %arg1: i32) -> (i32, i32) {
    %c0_i32 = arith.constant 0 : i32
    %c0_i32_0 = arith.constant 0 : i32
    %c0_i32_1 = arith.constant 0 : i32
    return %c0_i32, %c0_i32_0 : i32, i32
  }
  func.func @transform_9(%arg0: i32, %arg1: i32) -> (i32, i32) {
    %c0_i32 = arith.constant 0 : i32
    %c0_i32_0 = arith.constant 0 : i32
    %c0_i32_1 = arith.constant 0 : i32
    return %c0_i32, %c0_i32_0 : i32, i32
  }
  func.func @transform_10(%arg0: i32, %arg1: i32) -> (i32, i32) {
    %c0_i32 = arith.constant 0 : i32
    %c0_i32_0 = arith.constant 0 : i32
    %c0_i32_1 = arith.constant 0 : i32
    return %c0_i32, %c0_i32_0 : i32, i32
  }
  func.func @transform_11(%arg0: i32, %arg1: i32) -> (i32, i32, i32) {
    %c0_i32 = arith.constant 0 : i32
    %c0_i32_0 = arith.constant 0 : i32
    return %arg0, %c0_i32, %arg1 : i32, i32, i32
  }
}

</mosaic_0001>

<bundles_post_ra>
// kernel: pointnet_fp_forward.1
= control target key start
LH: loop header
LB: loop body
LE: loop exit
PB: predicated region body
PF: predicated region fallthrough
CT: control target
= control target key end

     0   :  { %s1691_s0 = inlined_call_operand.vmem [shape: f32[2,3,16], index: 0, kind: input, shape index: {}]   ;;  %s1692_s1 = inlined_call_operand.vmem [shape: f32[2,1,16], index: 1, kind: input, shape index: {}]   ;;  %s1693_s2 = inlined_call_operand.vmem [shape: f32[2,8,3], index: 2, kind: input, shape index: {}]   ;;  %s1694_s3 = inlined_call_operand.vmem [shape: f32[2,8,1], index: 3, kind: input, shape index: {}]   ;;  %s1695_s4 = inlined_call_operand.vmem [shape: f32[2,6,8], index: 4, kind: input, shape index: {}]   ;;  %s1696_s5 = inlined_call_operand.vmem [shape: f32[2,4,16], index: 5, kind: input, shape index: {}]   ;;  %s1697_s6 = inlined_call_operand.vmem [shape: bf16[32,4], index: 6, kind: input, shape index: {}]   ;;  %s1698_s7 = inlined_call_operand.vmem [shape: bf16[32,6], index: 7, kind: input, shape index: {}]   ;;  %s1699_s8 = inlined_call_operand.vmem [shape: f32[32,1], index: 8, kind: input, shape index: {}]   ;;  %s1700_s9 = inlined_call_operand.vmem [shape: bf16[16,32], index: 9, kind: input, shape index: {}]   ;;  %s1701_s10 = inlined_call_operand.vmem [shape: f32[16,1], index: 10, kind: input, shape index: {}]   ;;  %s1702_s11 = inlined_call_operand.hbm [shape: f32[2,16,16], index: 11, kind: output, shape index: {}]  }
   0x1   :  { %1705 = sst [smem:[#allocation8_spill]] %s1691_s0 }
   0x2   :  { %16 = vsyncpa [#allocation3], 0 }
   0x3   :  { %18 = vsyncpa [#allocation3 + $0x1], 0  ;;  %s1473_s17 = smov 0   ;;  %s1475_s18 = smov 0  }
   0x4   :  { %s1477_s19 = smov 0   ;;  %s1479_s20 = smov 0  }
   0x5   :  { %s1481_s21 = smov 0   ;;  %s1483_s22 = smov 0  }
   0x6 LB: > { %1706 = sst [smem:[#allocation5_spill]] %s1401_s21  ;;  %s1175_s23 = sadd.s32 4294967295, %s1405_s22   ;;  %s1405_s22 = sphi %s1483_s22, %s24_s22   ;;  %s1401_s21 = sphi %s1481_s21, %s1714_s21   ;;  %s1397_s20 = sphi %s1479_s20, %s1713_s20   ;;  %s1393_s19 = sphi %s1477_s19, %s1717_s19   ;;  %s1389_s18 = sphi %s1475_s18, %s1716_s18   ;;  %s1385_s17 = sphi %s1473_s17, %s1715_s17  }
   0x7   : > { %s1176_s24 = sadd.s32 4294967294, %s1405_s22   ;;  %s36_s25 = sadd.s32 1, %s1401_s21 }
   0x8   : > { %s312_s26 = sadd.s32 1, %s1393_s19  ;;  %p38_p0 = scmp.ge.s32.totalorder %s36_s25, 2 }
   0x9   : > { %p322_p1 = scmp.ne.s32.totalorder %s1393_s19, %s1389_s18  ;;  %p323_p2 = scmp.eq.s32.totalorder %s1175_s23, 1 }
   0xa   : > { %p328_p3 = scmp.ne.s32.totalorder %s1389_s18, %s1385_s17  ;;  %s1719_s25 = smov (%p38_p0, %s36_s25), 0 }
   0xb   : > { %1707 = sst [smem:[#allocation6_spill]] %s1719_s25  ;;  %p1513_p4 = por %p323_p2, %p322_p1 }
   0xc   : > { %p329_p5 = scmp.eq.s32.totalorder %s1176_s24, 1  ;;  %s307_s28 = ssub.s32 %s1401_s21, %s1719_s25 }
   0xd   : > { %p1179_p6 = scmp.ge.s32.totalorder %s1405_s22, 1  ;;  %p310_p7 = scmp.eq.s32.totalorder %s307_s28, 0 }
   0xe   : > { %p1520_p8 = por %p329_p5, %p328_p3  ;;  %p412_p9 = scmp.lt.s32.totalorder %s1405_s22, 3 }
   0xf   : > { %s1526_s30 = scalar_select %p310_p7, %s1393_s19, %s312_s26  }
  0x10   : > { %p413_p10 = pnand %p1179_p6, %p412_p9 }
  0x11   : > { %1710 = sst [smem:[#allocation7_spill]] %s1526_s30  ;;  %p479_p11 = scmp.lt.s32.totalorder (!%p413_p10), %s1397_s20, 1 }
  0x12   : > { %416 = sbr.rel (%p413_p10) target bundleno = 968 (0x3c8), region = 64  ;;  %s1711_s0 = sld [smem:[#allocation8_spill]] (!%p413_p10) }
  0x13   : > { %s476_s25 = sand.u32 (!%p413_p10), 1, %s1389_s18  }
  0x17   : > { %v1407_v0 = vmov 0.0   ;;  %vm1408_vm0 = vmmov 0   ;;  %s1533_s12 = scalar_select %p479_p11, %s1397_s20, 1  ;;  %vm527_vm1 = vcmask 1042432   ;;  %v1409_v1 = vmov 0   ;;  %v922_v5 = vld [vmem:[%s1699_s8 + $0x10] sm:$0xff] }
  0x18   : > { %1222 = vmatprep.subr.mxu1 %v1407_v0  ;;  %1224 = vmatprep.mubr.msk.f32.mxu1 %vm1408_vm0, %v1407_v0  ;;  %vm523_vm2 = vcmask 23552   ;;  %v921_v6 = vld [vmem:[%s1699_s8 + $0x8] sm:$0xff]  ;;  %vm798_vm3 = vcmask 1041408   ;;  %vm610_vm4 = vcmask 130048   ;;  %v608_v21 = vlaneseq }
  0x19   : > { %1314 = vset.pattern.permute.xlu0 %v1409_v1  ;;  %1315 = vset.pattern.permute.xlu1 %v1409_v1  ;;  %s1181_s13 = sshll.u32 %s1533_s12, 2  ;;  %s1537_s14 = sshll.u32 %s1533_s12, 3  ;;  %v957_v7 = vld [vmem:[%s1701_s10 + $0x8] sm:$0xff] }
  0x1a   : > { %s485_s23 = scalar_lea.vmem %s1711_s0, %s1181_s13  ;;  %s495_s28 = scalar_lea.vmem %s1693_s2, %s1537_s14  ;;  %v1575_v24 = vshrl.u32 %v608_v21, 7 }
  0x1b   : > { %v512_v2 = vld [vmem:[%s485_s23] sm:$0x7]  ;;  %s499_s30 = scalar_lea.vmem %s1694_s3, %s1537_s14  ;;  %s491_s0 = scalar_lea.vmem %s1692_s1, %s1533_s12 }
  0x1c   : > { %v513_v3 = vld [vmem:[%s495_s28] sm:$0xff]  ;;  %1223 = vmatpush3.msk.msra.mxu1 %vm527_vm1, %v512_v2  ;;  %s510_s28 = scalar_lea.vmem %s1696_s5, %s1181_s13  ;;  %s503_s13 = scalar_lea.vmem %s1695_s4, %s1537_s14 }
  0x1d   : > { %v515_v4 = vld [vmem:[%s499_s30] sm:$0xff]  ;;  %1225 = vmatmul.mubr.msk.f32.vlgmr.msra.gmra.mxu1 %vm523_vm2, %v513_v3  ;;  %1227 = vmatprep.subr.mxu1 %v1407_v0  ;;  %s1180_s14 = sshll.u32 %s476_s25, 4 }
  0x1e   : > { %603 = vperm.xlu0 %1314, %v515_v4   ;;  %1229 = vmatprep.mubr.msk.f32.mxu1 %vm1408_vm0, %v1407_v0  ;;  %v779_v8 = vld [vmem:[%s510_s28] sm:$0xf]  ;;  %s478_s30 = scalar_lea.vmem [#allocation2], %s1180_s14  ;;  %s1208_s28 = sshll.u32 %s1397_s20, 8 }
  0x1f   : > { %v1570_v9 = vpack.c.bf16 %v779_v8, %v779_v8  ;;  %v1186_v10 = vld [vmem:[%s491_s0] ss:$0 sm:$0xff]  ;;  %s1037_s26 = sshll.u32 %s478_s30, 4  ;;  %s1643_s0 = scalar_lea.hbm %s1702_s11, %s1208_s28  ;;  %s1638_s26 = int_to_ptr.vmem [resolvable:$true] %s1037_s26 }
  0x20   : > { %s1646_s20 = scalar_lea.sflag [#allocation3], %s476_s25  ;;  %s1329_s12 = scalar_lea.vmem %s1638_s26, 256 }
  0x21   : > { %1252 = vmatprep.subr.msk.bf16.mxu0 %vm798_vm3, %v1570_v9  ;;  %p1330_p12 = scmp.ne.s32.totalorder %s1638_s26, %s1329_s12 }
  0x22   : > { %936 = vperm.xlu0 %1314, %v922_v5  }
  0x23   : > { %p1331_p13 = pnand %p1330_p12, %p1513_p4 }
  0x25   : > { %p1332_p0 = pneg %p1331_p13 }
  0x26   : > { %931 = vperm.xlu0 %1314, %v921_v6  }
  0x2a   : > { %965 = vperm.xlu0 %1314, %v957_v7  }
  0x99   : > { %v604_v13 = vpop.permute.xlu0 %603 }
  0xdd   : > { %v597_v11 = vpop.f32.mrf.mxu1 }
  0xde   : > { %v598_v12 = vadd.f32 %v1186_v10, %v597_v11 }
  0xdf   : > { %v1226_v14 = vpop.f32.mrf.mxu1 }
  0xe0   : > { %v606_v15 = vadd.f32 %v604_v13, %v598_v12 }
  0xe2   : > { %v607_v16 = vmax.f32 %v606_v15, 0.0 }
  0xe4   : > { %v611_v17 = vsel %vm610_vm4, %v607_v16, inf }
  0xe5   : > { %v612_v18 = vrot.slane %v611_v17, 4 }
  0xe7   : > { %v613_v19 = vmin.f32 %v611_v17, %v612_v18 }
  0xe9   : > { %v614_v20 = vrot.slane %v613_v19, 2 }
  0xeb   : > { %v615_v22 = vmin.f32 %v613_v19, %v614_v20 }
  0xed   : > { %v616_v23 = vrot.slane %v615_v22, 1 }
  0xef   : > { %v617_v25 = vmin.f32 %v615_v22, %v616_v23 }
  0xf1   : > { %vm618_vm5 = vcmp.eq.f32.partialorder %v607_v16, %v617_v25  ;;  %v631_v57 = vadd.f32 1e-08, %v617_v25  ;;  %v516_v25 = vld [vmem:[%s503_s13] sm:$0x3f]  ;;  %s1410_s13 = smov [#allocation2]  }
  0xf2   : > { %v619_v26 = vsel %vm618_vm5, %v1575_v24, 8  ;;  %s1333_s23 = sshll.u32 %s1410_s13, 4  ;;  %s1334_s23 = int_to_ptr.vmem [resolvable:$false] %s1333_s23 }
  0xf3   : > { %v620_v27 = vsel %vm610_vm4, %v619_v26, 2147483647  ;;  %v800_v26 = vsel %vm798_vm3, %v1570_v9, 0  ;;  %v1318_v9 = vld [vmem:[%s1698_s7] sm:$0xff]   ;;  %vm861_vm3 = vcmask 48128   ;;  %s1335_s24 = scalar_lea.vmem %s1334_s23, 512  ;;  %p1336_p1 = scmp.lt.s32.totalorder %s1638_s26, %s1334_s23 }
  0xf4   : > { %v621_v28 = vrot.slane %v620_v27, 4  ;;  %1233 = vmatpush3.bf16.msra.mxu0 %v800_v26  ;;  %p1337_p2 = scmp.lt.s32.totalorder %s1335_s24, %s1329_s12 }
  0xf5   : > { %1244 = vmatprep.subr.bf16.mxu0 %v1407_v0 }
  0xf6   : > { %vm622_vm6 = vcmp.lt.s32.totalorder %v620_v27, %v621_v28  ;;  %p1338_p3 = por %p1337_p2, %p1336_p1 }
  0xf7   : > { %v623_v29 = vsel %vm622_vm6, %v620_v27, %v621_v28  ;;  %v1317_v27 = vld [vmem:[%s1697_s6 + $0x8] sm:$0xff]   ;;  %v923_v28 = vld [vmem:[%s1699_s8 + $0x18] sm:$0xff] }
  0xf8   : > { %v624_v30 = vrot.slane %v623_v29, 2  ;;  %941 = vperm.xlu1 %1315, %v923_v28   ;;  %p1339_p5 = pnand %p1338_p3, %p1332_p0 }
  0xfa   : > { %vm625_vm7 = vcmp.lt.s32.totalorder %v623_v29, %v624_v30 }
  0xfb   : > { %v626_v31 = vsel %vm625_vm7, %v623_v29, %v624_v30  ;;  %v920_v29 = vld [vmem:[%s1699_s8] sm:$0xff] }
  0xfc   : > { %v627_v32 = vrot.slane %v626_v31, 1  ;;  %926 = vperm.xlu1 %1315, %v920_v29   ;;  %v956_v30 = vld [vmem:[%s1701_s10] sm:$0xff] }
  0xfe   : > { %vm628_vm8 = vcmp.lt.s32.totalorder %v626_v31, %v627_v32 }
  0xff   : > { %v629_v33 = vsel %vm628_vm8, %v626_v31, %v627_v32  ;;  %vm696_vm8 = vcmask 64512  }
 0x100   : > { %vm630_vm9 = vcmp.eq.s32.totalorder %v1575_v24, %v629_v33  ;;  %960 = vperm.xlu1 %1315, %v956_v30  }
 0x101   : > { %v633_v34 = vsel %vm630_vm9, inf, %v607_v16  ;;  %v1189_v16 = vsel %vm630_vm9, 1.0, %v1407_v0  ;;  %vm791_vm9 = vcmask 31744  }
 0x102   : > { %v634_v35 = vsel %vm610_vm4, %v633_v34, inf }
 0x103   : > { %v635_v36 = vrot.slane %v634_v35, 4 }
 0x105   : > { %v636_v37 = vmin.f32 %v634_v35, %v635_v36  ;;  %v1319_v35 = vld [vmem:[%s1698_s7 + $0x8] sm:$0xff]  }
 0x107   : > { %v637_v38 = vrot.slane %v636_v37, 2 }
 0x109   : > { %v638_v39 = vmin.f32 %v636_v37, %v637_v38 }
 0x10b   : > { %v639_v40 = vrot.slane %v638_v39, 1 }
 0x10d   : > { %v640_v41 = vmin.f32 %v638_v39, %v639_v40  ;;  %v937_v39 = vpop.permute.xlu0 %936 }
 0x10f   : > { %vm641_vm10 = vcmp.eq.f32.partialorder %v633_v34, %v640_v41  ;;  %v654_v55 = vadd.f32 1e-08, %v640_v41 }
 0x110   : > { %v642_v42 = vsel %vm641_vm10, %v1575_v24, 8 }
 0x111   : > { %v643_v43 = vsel %vm610_vm4, %v642_v42, 2147483647  ;;  %1321 = vrcp.f32 %v654_v55 }
 0x112   : > { %v644_v44 = vrot.slane %v643_v43, 4  ;;  %1323 = vrcp.f32 %v631_v57 }
 0x114   : > { %vm645_vm11 = vcmp.lt.s32.totalorder %v643_v43, %v644_v44 }
 0x115   : > { %v646_v45 = vsel %vm645_vm11, %v643_v43, %v644_v44 }
 0x116   : > { %v647_v46 = vrot.slane %v646_v45, 2 }
 0x118   : > { %vm648_vm12 = vcmp.lt.s32.totalorder %v646_v45, %v647_v46 }
 0x119   : > { %v649_v47 = vsel %vm648_vm12, %v646_v45, %v647_v46 }
 0x11a   : > { %v650_v48 = vrot.slane %v649_v47, 1 }
 0x11c   : > { %vm651_vm13 = vcmp.lt.s32.totalorder %v649_v47, %v650_v48 }
 0x11d   : > { %v652_v49 = vsel %vm651_vm13, %v649_v47, %v650_v48 }
 0x11e   : > { %vm653_vm14 = vcmp.eq.s32.totalorder %v1575_v24, %v652_v49  ;;  %v1322_v2 = vpop.eup %1321 }
 0x11f   : > { %v656_v50 = vsel %vm653_vm14, inf, %v633_v34  ;;  %v1324_v4 = vpop.eup %1323  ;;  %v1190_v17 = vsel %vm653_vm14, 1.0, %v1407_v0 }
 0x120   : > { %v657_v51 = vsel %vm610_vm4, %v656_v50, inf  ;;  %v679_v5 = vadd.f32 %v1324_v4, %v1322_v2 }
 0x121   : > { %v658_v52 = vrot.slane %v657_v51, 4 }
 0x123   : > { %v659_v53 = vmin.f32 %v657_v51, %v658_v52  ;;  %v932_v52 = vpop.permute.xlu0 %931 }
 0x125   : > { %v660_v54 = vrot.slane %v659_v53, 2 }
 0x127   : > { %v661_v56 = vmin.f32 %v659_v53, %v660_v54 }
 0x129   : > { %v662_v58 = vrot.slane %v661_v56, 1 }
 0x12b   : > { %v663_v59 = vmin.f32 %v661_v56, %v662_v58 }
 0x12d   : > { %vm664_vm15 = vcmp.eq.f32.partialorder %v656_v50, %v663_v59  ;;  %v677_v60 = vadd.f32 1e-08, %v663_v59 }
 0x12e   : > { %v665_v61 = vsel %vm664_vm15, %v1575_v24, 8 }
 0x12f   : > { %v666_v62 = vsel %vm610_vm4, %v665_v61, 2147483647  ;;  %1325 = vrcp.f32 %v677_v60 }
 0x130   : > { %v667_v63 = vrot.slane %v666_v62, 4 }
 0x132   : > { %vm668_vm2 = vcmp.lt.s32.totalorder %v666_v62, %v667_v63 }
 0x133   : > { %v669_v1 = vsel %vm668_vm2, %v666_v62, %v667_v63  ;;  %v1320_v62 = vld [vmem:[%s1700_s9] sm:$0xff]  }
 0x134   : > { %v670_v3 = vrot.slane %v669_v1, 2 }
 0x136   : > { %vm671_vm5 = vcmp.lt.s32.totalorder %v669_v1, %v670_v3 }
 0x137   : > { %v672_v8 = vsel %vm671_vm5, %v669_v1, %v670_v3 }
 0x138   : > { %v673_v10 = vrot.slane %v672_v8, 1 }
 0x13a   : > { %vm674_vm6 = vcmp.lt.s32.totalorder %v672_v8, %v673_v10 }
 0x13b   : > { %v675_v11 = vsel %vm674_vm6, %v672_v8, %v673_v10 }
 0x13c   : > { %v1326_v6 = vpop.eup %1325  ;;  %vm676_vm7 = vcmp.eq.s32.totalorder %v1575_v24, %v675_v11  ;;  %v1316_v24 = vld [vmem:[%s1697_s6] sm:$0xff]  }
 0x13d   : > { %v680_v7 = vadd.f32 %v1326_v6, %v679_v5  ;;  %v1191_v20 = vsel %vm676_vm7, 1.0, %v1407_v0  ;;  %1234 = vmatprep.mubr.msk.bf16.mxu0 %vm791_vm9, %v1316_v24 }
 0x13e   : > { %1235 = vmatmul.mubr.msk.bf16.vlgmr.msra.gmra.mxu0 %vm791_vm9, %v1317_v27 }
 0x13f   : > { %1327 = vrcp.f32 %v680_v7  ;;  %1248 = vmatprep.mubr.msk.bf16.mxu0 %vm1408_vm0, %v1407_v0  ;;  %vm973_vm0 = vcmask 261120  }
 0x14c   : > { %v1328_v12 = vpop.eup %1327 }
 0x14d   : > { %v682_v13 = vmul.f32 %v1328_v12, %v1324_v4  ;;  %v686_v14 = vmul.f32 %v1328_v12, %v1322_v2  ;;  %v691_v15 = vmul.f32 %v1328_v12, %v1326_v6 }
 0x14f   : > { %v685_v18 = vmul.f32 %v1189_v16, %v682_v13  ;;  %v689_v19 = vmul.f32 %v1190_v17, %v686_v14  ;;  %v694_v22 = vmul.f32 %v1191_v20, %v691_v15 }
 0x151   : > { %v690_v21 = vadd.f32 %v689_v19, %v685_v18 }
 0x153   : > { %v695_v23 = vadd.f32 %v694_v22, %v690_v21 }
 0x155   : > { %1228 = vmatpush3.msra.mxu1 %v695_v23 }
 0x156   : > { %1230 = vmatmul.mubr.msk.f32.vlgmr.msra.gmra.mxu1 %vm696_vm8, %v516_v25 }
 0x157   : > { %1240 = vmatprep.mubr.msk.bf16.mxu1 %vm861_vm3, %v1318_v9 }
 0x173   : > { %v942_v40 = vpop.permute.xlu1 %941 }
 0x177   : > { %v927_v53 = vpop.permute.xlu1 %926 }
 0x17b   : > { %v961_v63 = vpop.permute.xlu1 %960 }
 0x1fe   : > { %v1236_v36 = vpop.f32.mrf.mxu0 }
 0x200   : > { %v836_v37 = vpop.f32.mrf.mxu0 }
 0x202   : > { %v1237_v42 = vpop.f32.mrf.mxu0 }
 0x204   : > { %v839_v48 = vpop.f32.mrf.mxu0 }
 0x216   : > { %v766_v31 = vpop.f32.mrf.mxu1 }
 0x217   : > { %v774_v32 = vpack.c.bf16 %v766_v31, %v766_v31 }
 0x218   : > { %v1231_v33 = vpop.f32.mrf.mxu1 }
 0x219   : > { %v869_v34 = vsel %vm527_vm1, %v774_v32, 0  ;;  %1253 = vmatprep.subr.msk.bf16.mxu1 %vm527_vm1, %v774_v32 }
 0x21a   : > { %1239 = vmatpush3.bf16.msra.mxu1 %v869_v34 }
 0x21d   : > { %1241 = vmatmul.mubr.msk.bf16.vlgmr.msra.gmra.mxu1 %vm861_vm3, %v1319_v35 }
 0x2dd   : > { %v1242_v38 = vpop.f32.mrf.mxu1 }
 0x2de   : > { %v914_v41 = vadd.f32 %v1242_v38, %v1236_v36 }
 0x2df   : > { %v905_v43 = vpop.f32.mrf.mxu1 }
 0x2e0   : > { %v946_v45 = vadd.f32 %v937_v39, %v914_v41  ;;  %v906_v46 = vadd.f32 %v905_v43, %v836_v37 }
 0x2e1   : > { %v1243_v44 = vpop.f32.mrf.mxu1 }
 0x2e2   : > { %v917_v47 = vadd.f32 %v1243_v44, %v1237_v42  ;;  %v950_v54 = vmax.f32 %v946_v45, 0.0  ;;  %v944_v55 = vadd.f32 %v927_v53, %v906_v46 }
 0x2e3   : > { %v908_v49 = vpop.f32.mrf.mxu1 }
 0x2e4   : > { %v947_v50 = vadd.f32 %v942_v40, %v917_v47  ;;  %v909_v51 = vadd.f32 %v908_v49, %v839_v48  ;;  %v948_v60 = vmax.f32 %v944_v55, 0.0 }
 0x2e6   : > { %v951_v56 = vmax.f32 %v947_v50, 0.0  ;;  %v945_v57 = vadd.f32 %v932_v52, %v909_v51 }
 0x2e8   : > { %v955_v58 = vpack.c.bf16 %v951_v56, %v950_v54  ;;  %v949_v59 = vmax.f32 %v945_v57, 0.0 }
 0x2ea   : > { %1245 = vmatpush3.bf16.msra.mxu0 %v955_v58  ;;  %v954_v61 = vpack.c.bf16 %v949_v59, %v948_v60 }
 0x2eb   : > { %1246 = vmatprep.subr.bf16.mxu0 %v1407_v0  ;;  %v966_v0 = vpop.permute.xlu0 %965 }
 0x2ee   : > { %1247 = vmatpush3.bf16.msra.mxu0 %v954_v61 }
 0x2f1   : > { %1249 = vmatmul.mubr.msk.bf16.vlgmr.msra.gmra.mxu0 %vm973_vm0, %v1320_v62 }
 0x3b1   : > { %v1011_v1 = vpop.f32.mrf.mxu0 }
 0x3b2   : > { %v1012_v2 = vadd.f32 %v1011_v1, %v961_v63 }
 0x3b3   : > { %v1250_v3 = vpop.f32.mrf.mxu0 }
 0x3b4   : > { %v1018_v4 = vmax.f32 %v1012_v2, 0.0 }
 0x3b5   : > { %v1014_v5 = vpop.f32.mrf.mxu0 }
 0x3b6   : > { %1020 = vst.msk [vmem:[%s478_s30] sm:$0xff] %vm610_vm4, %v1018_v4  ;;  %v1015_v6 = vadd.f32 %v1014_v5, %v966_v0 }
 0x3b7   : > { %v1251_v7 = vpop.f32.mrf.mxu0 }
 0x3b8   : > { %v1019_v8 = vmax.f32 %v1015_v6, 0.0 }
 0x3ba   : > { %1021 = vst.msk [vmem:[%s478_s30 + $0x8] sm:$0xff] %vm610_vm4, %v1019_v8 }
 0x3bb   : > { %1342 = shalt.err (!%p1339_p5)
}
 0x3bc   : > { %s1343_s21 = scalar_lea.hbm %s1643_s0, 256  ;;  %s1347_s30 = scalar_lea.hbm %s1702_s11, 512 }
 0x3bd   : > { %p1344_p6 = scmp.ne.s32.totalorder %s1643_s0, %s1343_s21  ;;  %p1348_p10 = scmp.lt.s32.totalorder %s1643_s0, %s1702_s11 }
 0x3be   : > { %p1349_p11 = scmp.lt.s32.totalorder %s1347_s30, %s1343_s21 }
 0x3bf   : > { %p1345_p7 = pnand %p1344_p6, %p1513_p4 }
 0x3c0   : > { %p1350_p12 = por %p1349_p11, %p1348_p10 }
 0x3c1   : > { %p1346_p9 = pneg %p1345_p7 }
 0x3c3   : > { %p1351_p13 = pnand %p1350_p12, %p1346_p9 }
 0x3c5   : > { %1354 = shalt.err (!%p1351_p13)
}
 0x3c6   : > { %s1411_s16 = smov 128   ;;  %s1412_s12 = smov 8  }
 0x3c7   : > { %1254 = dma.vmem_to_hbm [thread:$0]  (%p1513_p4), %s1638_s26, 256, %s1643_s0, %s1646_s20, %s1411_s16, %s1411_s16, %s1412_s12  }
 0x3c8 PF: > { %p1260_p0 = scmp.ge.s32.totalorder %s1405_s22, 2  ;;  %s1052_s13 = sand.u32 1, %s1385_s17  }
 0x3c9   : > { %s1053_s23 = scalar_lea.sflag [#allocation3], %s1052_s13 }
 0x3ca   : > { %p1257_p1 = pnand %p1260_p0, %p1520_p8 }
 0x3cc   : > { %p1258_p2 = pneg %p1257_p1 }
 0x3ce   : > { %1380 = dma.done.wait (%p1258_p2), %s1053_s23, 256  }
 0x3cf   : > { %1382 = vsyncadd (%p1258_p2), %s1053_s23, 4294967040  ;;  %s24_s22 = sadd.s32 1, %s1405_s22   ;;  %s1712_s24 = sld [smem:[#allocation7_spill]] }
 0x3d0   : > { %p21_p3 = scmp.ge.s32.totalorder %s24_s22, 4   ;;  %s1713_s20 = sld [smem:[#allocation5_spill]] }
 0x3d1   : > { %s1714_s21 = sld [smem:[#allocation6_spill]]  ;;  %s1715_s17 = smov %s1389_s18 }
 0x3d2   : > { %s1716_s18 = smov %s1393_s19  ;;  %23 = sbr.rel (!%p21_p3) target bundleno = 6 (0x6), region = 114 }
 0x3d5   : > { %s1717_s19 = smov %s1712_s24 }
 0x3d7   :  { %1058 = vsyncpa [#allocation3], 1 }
 0x3d8   :  { %1060 = vsyncpa [#allocation3 + $0x1], 1 }

</bundles_post_ra>
